<compile_context>
chip_gen: v5e
topology: v5e:2x2
jax: 0.10.0
libtpu: 0.0.40
codegen_flags: <defaults>
</compile_context>

<pallas_src>
import functools

import jax
import jax.numpy as jnp
from jax.experimental import pallas as pl
from jax.experimental.pallas import tpu as pltpu

# TODO(synk): the CLAP encoders (HTS-AT + RoBERTa) and AutoProcessor feature
# extraction are not re-implemented; synthetic linear projections stand in for
# the encoder outputs.  The CLAP *head* semantics below are exact.


def _round_up(x, m):
    return ((x + m - 1) // m) * m


def clap_head_kernel(scale_ref, labels_ref, xa_ref, wa_ref, wtt_ref, xtt_ref,
                     loss_ref, logits_ref, t_ref, acc_ref,
                     *, true_b, true_l, tb):
    i = pl.program_id(0)
    n = pl.num_programs(0)

    # --- text branch: computed once, kept resident in VMEM scratch ---------
    @pl.when(i == 0)
    def _():
        # (Dp, Lp) = (D, Ft) @ (Ft, L): text embeds produced pre-transposed so
        # the logits matmul below is a plain (B,D)x(D,L) MXU dot.
        t = jnp.dot(wtt_ref[...], xtt_ref[...],
                    preferred_element_type=jnp.float32)
        inv_t = jax.lax.rsqrt(jnp.maximum(
            jnp.sum(t * t, axis=0, keepdims=True), 1e-12))
        t_ref[...] = (t * inv_t).astype(jnp.bfloat16)
        acc_ref[...] = jnp.zeros_like(acc_ref)

    # --- audio branch: bf16 MXU operands, f32 accumulation -----------------
    a = jnp.dot(xa_ref[...], wa_ref[...], preferred_element_type=jnp.float32)
    inv_a = jax.lax.rsqrt(jnp.maximum(
        jnp.sum(a * a, axis=-1, keepdims=True), 1e-12))
    a = a * inv_a                                                   # (TB, Dp)

    # --- logits_per_audio = audio_embeds @ text_embeds.T * exp(scale) ------
    scale = jnp.exp(scale_ref[0])
    logits = jnp.dot(a.astype(jnp.bfloat16), t_ref[...],
                     preferred_element_type=jnp.float32) * scale    # (TB, Lp)
    logits_ref[...] = logits                                        # lane-dense

    # --- CrossEntropyLoss(logits, y), reduction='mean' over the true batch -
    tb_rows, lp = logits.shape
    col = jax.lax.broadcasted_iota(jnp.int32, (tb_rows, lp), 1)
    col_valid = col < true_l                       # mask padded label columns
    z = jnp.where(col_valid, logits, -jnp.inf)
    m = jnp.max(z, axis=-1, keepdims=True)
    lse = m + jnp.log(jnp.sum(jnp.exp(z - m), axis=-1, keepdims=True))
    onehot = (col == labels_ref[...]).astype(jnp.float32)
    picked = jnp.sum(logits * onehot, axis=-1, keepdims=True)
    per_example = lse - picked                                      # (TB, 1)

    row = i * tb + jax.lax.broadcasted_iota(jnp.int32, (tb_rows, 1), 0)
    row_valid = row < true_b                       # mask padded batch rows
    tile_sum = jnp.sum(jnp.where(row_valid, per_example, 0.0),
                       axis=0, keepdims=True)                       # (1, 1)
    acc_ref[...] += tile_sum

    @pl.when(i == n - 1)
    def _():
        loss_ref[...] = acc_ref[...] * (1.0 / true_b)   # divide by TRUE B


def clap_language_audio_classifier(audio_feats, text_feats, wa, wt,
                                   logit_scale_a, labels, *, tile_b=None):
    """Returns (loss, logits_per_audio) just like the PyTorch module."""
    B, Fa = audio_feats.shape
    L, Ft = text_feats.shape
    D = wa.shape[1]

    # Hardware-aligned padding: batch tiles multiple of 16 (bf16 sublane
    # packing), lane (last) axes multiples of 128.  tile_b can be raised for
    # real CLAP batch sizes (keep 2x double-buffered (TB,Fa)+(TB,L) blocks
    # plus resident Wa/Wt^T/text^T within the scoped-VMEM limit: 16 MiB v5e,
    # 32 MiB v6e/v7x defaults).
    tb = tile_b if tile_b is not None else min(_round_up(B, 16), 256)
    Bp = _round_up(B, tb)
    Fap = _round_up(Fa, 128)
    Ftp = _round_up(Ft, 128)
    Dp = _round_up(D, 128)
    Lp = _round_up(L, 128)

    bf16 = jnp.bfloat16
    xa = jnp.zeros((Bp, Fap), bf16).at[:B, :Fa].set(audio_feats.astype(bf16))
    wa_p = jnp.zeros((Fap, Dp), bf16).at[:Fa, :D].set(wa.astype(bf16))
    # Text side passed pre-transposed so the kernel never transposes.
    wt_t = jnp.zeros((Dp, Ftp), bf16).at[:D, :Ft].set(wt.T.astype(bf16))
    xt_t = jnp.zeros((Ftp, Lp), bf16).at[:Ft, :L].set(text_feats.T.astype(bf16))
    labels_p = jnp.zeros((Bp, 1), jnp.int32).at[:B, 0].set(
        labels.astype(jnp.int32))
    scale_arr = jnp.reshape(logit_scale_a.astype(jnp.float32), (1,))

    grid = (Bp // tb,)
    kernel = functools.partial(clap_head_kernel, true_b=B, true_l=L, tb=tb)

    flops = 2 * (Bp * Fap * Dp + Dp * Ftp * Lp + Bp * Dp * Lp)
    bytes_accessed = (2 * (xa.size + wa_p.size + wt_t.size + xt_t.size)
                      + 4 * (labels_p.size + 1 + Bp * Lp + 1))

    loss, logits_pad = pl.pallas_call(
        kernel,
        grid=grid,
        out_shape=(
            jax.ShapeDtypeStruct((1, 1), jnp.float32),    # loss
            jax.ShapeDtypeStruct((Bp, Lp), jnp.float32),  # logits_per_audio
        ),
        in_specs=[
            pl.BlockSpec(memory_space=pltpu.MemorySpace.SMEM),  # logit scale
            pl.BlockSpec((tb, 1), lambda i: (i, 0)),            # labels
            pl.BlockSpec((tb, Fap), lambda i: (i, 0)),          # audio feats
            pl.BlockSpec((Fap, Dp), lambda i: (0, 0)),          # Wa (resident)
            pl.BlockSpec((Dp, Ftp), lambda i: (0, 0)),          # Wt^T (resident)
            pl.BlockSpec((Ftp, Lp), lambda i: (0, 0)),          # text feats^T
        ],
        out_specs=(
            pl.BlockSpec((1, 1), lambda i: (0, 0)),             # loss
            pl.BlockSpec((tb, Lp), lambda i: (i, 0)),           # logits
        ),
        scratch_shapes=[
            pltpu.VMEM((Dp, Lp), jnp.bfloat16),   # normalized text embeds^T
            pltpu.VMEM((1, 1), jnp.float32),      # loss accumulator
        ],
        compiler_params=pltpu.CompilerParams(
            dimension_semantics=("arbitrary",)),
        cost_estimate=pl.CostEstimate(
            flops=flops,
            transcendentals=Bp * Lp + Bp + Lp + 1,
            bytes_accessed=bytes_accessed),
    )(scale_arr, labels_p, xa, wa_p, wt_t, xt_t)

    return loss[0, 0], logits_pad[:B, :L]


if __name__ == "__main__":
    # Small synthetic shapes consistent with the CLAP head:
    B, L = 2, 4              # batch of audio clips, number of text labels
    Fa, Ft, D = 64, 48, 32   # audio/text feature dims, shared embedding dim

    key = jax.random.PRNGKey(0)
    k_xa, k_xt, k_wa, k_wt, k_y = jax.random.split(key, 5)

    audio_feats = jax.random.normal(k_xa, (B, Fa), dtype=jnp.float32)
    text_feats = jax.random.normal(k_xt, (L, Ft), dtype=jnp.float32)
    wa = jax.random.normal(k_wa, (Fa, D), dtype=jnp.float32) / jnp.sqrt(Fa)
    wt = jax.random.normal(k_wt, (Ft, D), dtype=jnp.float32) / jnp.sqrt(Ft)
    # CLAP initializes logit_scale_a = log(1 / 0.07)
    logit_scale_a = jnp.array(jnp.log(1.0 / 0.07), dtype=jnp.float32)
    labels = jax.random.randint(k_y, (B,), 0, L, dtype=jnp.int32)

    loss, logits = clap_language_audio_classifier(
        audio_feats, text_feats, wa, wt, logit_scale_a, labels)
    jax.block_until_ready((loss, logits))

    # Pure-JAX reference with matching bf16 MXU operands / f32 accumulation.
    bf16 = jnp.bfloat16
    a = jnp.dot(audio_feats.astype(bf16), wa.astype(bf16),
                preferred_element_type=jnp.float32)
    t = jnp.dot(text_feats.astype(bf16), wt.astype(bf16),
                preferred_element_type=jnp.float32)
    a = a * jax.lax.rsqrt(jnp.maximum(jnp.sum(a * a, -1, keepdims=True), 1e-12))
    t = t * jax.lax.rsqrt(jnp.maximum(jnp.sum(t * t, -1, keepdims=True), 1e-12))
    ref_logits = jnp.dot(a.astype(bf16), t.astype(bf16).T,
                         preferred_element_type=jnp.float32) * jnp.exp(
                             logit_scale_a)
    ref_loss = jnp.mean(
        jax.nn.logsumexp(ref_logits, axis=-1)
        - jnp.take_along_axis(ref_logits, labels[:, None], axis=-1)[:, 0])

    assert jnp.allclose(logits, ref_logits, atol=3e-2, rtol=3e-2), (
        float(jnp.max(jnp.abs(logits - ref_logits))))
    assert jnp.allclose(loss, ref_loss, atol=3e-2, rtol=3e-2), (
        float(jnp.abs(loss - ref_loss)))

    print("KERNEL_OK")
</pallas_src>

<mosaic_0001>
module attributes {stable_mosaic.version = 11 : i64} {
  func.func @clap_head_kernel(%arg0: i32, %arg1: memref<1xf32, #tpu.memory_space<smem>>, %arg2: memref<16x1xi32, #tpu.memory_space<vmem>>, %arg3: memref<16x128xbf16, #tpu.memory_space<vmem>>, %arg4: memref<128x128xbf16, #tpu.memory_space<vmem>>, %arg5: memref<128x128xbf16, #tpu.memory_space<vmem>>, %arg6: memref<128x128xbf16, #tpu.memory_space<vmem>>, %arg7: memref<1x1xf32, #tpu.memory_space<vmem>>, %arg8: memref<16x128xf32, #tpu.memory_space<vmem>>, %arg9: memref<128x128xbf16, #tpu.memory_space<vmem>>, %arg10: memref<1x1xf32, #tpu.memory_space<vmem>>) attributes {dimension_semantics = [#tpu.dimension_semantics<arbitrary>], iteration_bounds = array<i64: 1>, scalar_prefetch = 0 : i64, scratch_operands = 2 : i64, tpu.core_type = #tpu.core_type<tc>, window_params = [{transform_indices = @transform_0, window_bounds = array<i64: 1>}, {transform_indices = @transform_1, window_bounds = array<i64: 16, 1>}, {transform_indices = @transform_2, window_bounds = array<i64: 16, 128>}, {pipeline_mode = #tpu.pipeline_mode<synchronous>, transform_indices = @transform_3, window_bounds = array<i64: 128, 128>}, {pipeline_mode = #tpu.pipeline_mode<synchronous>, transform_indices = @transform_4, window_bounds = array<i64: 128, 128>}, {pipeline_mode = #tpu.pipeline_mode<synchronous>, transform_indices = @transform_5, window_bounds = array<i64: 128, 128>}, {pipeline_mode = #tpu.pipeline_mode<synchronous>, transform_indices = @transform_6, window_bounds = array<i64: 1, 1>}, {transform_indices = @transform_7, window_bounds = array<i64: 16, 128>}]} {
    %c0_i32 = arith.constant 0 : i32
    %0 = arith.cmpi eq, %arg0, %c0_i32 : i32
    %1 = arith.extui %0 : i1 to i32
    %c0_i32_0 = arith.constant 0 : i32
    %2 = arith.cmpi ne, %1, %c0_i32_0 : i32
    scf.if %2 {
      %c0_26 = arith.constant 0 : index
      %c0_27 = arith.constant 0 : index
      %61 = vector.load %arg5[%c0_26, %c0_27] : memref<128x128xbf16, #tpu.memory_space<vmem>>, vector<128x128xbf16>
      %c0_28 = arith.constant 0 : index
      %c0_29 = arith.constant 0 : index
      %62 = vector.load %arg6[%c0_28, %c0_29] : memref<128x128xbf16, #tpu.memory_space<vmem>>, vector<128x128xbf16>
      %cst_30 = arith.constant dense<0.000000e+00> : vector<128x128xf32>
      %63 = tpu.matmul %61, %62, %cst_30 {dimension_numbers = #tpu.dot_dimension_numbers<[1], [0], [0], [1], [0, 0, 1, 1], [], []>} : vector<128x128xbf16>, vector<128x128xbf16>, vector<128x128xf32> -> vector<128x128xf32>
      %64 = arith.mulf %63, %63 : vector<128x128xf32>
      %cst_31 = arith.constant dense<0.000000e+00> : vector<128xf32>
      %65 = vector.multi_reduction <add>, %64, %cst_31 [0] : vector<128x128xf32> to vector<128xf32>
      %66 = vector.shape_cast %65 : vector<128xf32> to vector<1x128xf32>
      %cst_32 = arith.constant 9.99999996E-13 : f32
      %67 = vector.broadcast %cst_32 : f32 to vector<1x128xf32>
      %68 = arith.maximumf %66, %67 : vector<1x128xf32>
      %69 = math.rsqrt %68 : vector<1x128xf32>
      %70 = vector.broadcast %69 : vector<1x128xf32> to vector<128x128xf32>
      %71 = arith.mulf %63, %70 : vector<128x128xf32>
      %72 = arith.truncf %71 : vector<128x128xf32> to vector<128x128xbf16>
      %c0_33 = arith.constant 0 : index
      %c0_34 = arith.constant 0 : index
      %73 = vector.load %arg9[%c0_33, %c0_34] : memref<128x128xbf16, #tpu.memory_space<vmem>>, vector<128x128xbf16>
      tpu.vector_store %arg9[%c0_33, %c0_34], %72 {strides = array<i32>} : memref<128x128xbf16, #tpu.memory_space<vmem>>, vector<128x128xbf16>,
      %cst_35 = arith.constant 0.000000e+00 : f32
      %74 = vector.broadcast %cst_35 : f32 to vector<1x1xf32>
      %c0_36 = arith.constant 0 : index
      %c0_37 = arith.constant 0 : index
      %75 = vector.load %arg10[%c0_36, %c0_37] : memref<1x1xf32, #tpu.memory_space<vmem>>, vector<1x1xf32>
      tpu.vector_store %arg10[%c0_36, %c0_37], %74 {strides = array<i32>} : memref<1x1xf32, #tpu.memory_space<vmem>>, vector<1x1xf32>,
    } else {
    }
    %c0 = arith.constant 0 : index
    %c0_1 = arith.constant 0 : index
    %3 = vector.load %arg3[%c0, %c0_1] : memref<16x128xbf16, #tpu.memory_space<vmem>>, vector<16x128xbf16>
    %c0_2 = arith.constant 0 : index
    %c0_3 = arith.constant 0 : index
    %4 = vector.load %arg4[%c0_2, %c0_3] : memref<128x128xbf16, #tpu.memory_space<vmem>>, vector<128x128xbf16>
    %cst = arith.constant dense<0.000000e+00> : vector<16x128xf32>
    %5 = tpu.matmul %3, %4, %cst {dimension_numbers = #tpu.dot_dimension_numbers<[1], [0], [0], [1], [0, 0, 1, 1], [], []>} : vector<16x128xbf16>, vector<128x128xbf16>, vector<16x128xf32> -> vector<16x128xf32>
    %6 = arith.mulf %5, %5 : vector<16x128xf32>
    %cst_4 = arith.constant dense<0.000000e+00> : vector<16xf32>
    %7 = vector.multi_reduction <add>, %6, %cst_4 [1] : vector<16x128xf32> to vector<16xf32>
    %8 = vector.shape_cast %7 : vector<16xf32> to vector<16x1xf32>
    %cst_5 = arith.constant 9.99999996E-13 : f32
    %9 = vector.broadcast %cst_5 : f32 to vector<16x1xf32>
    %10 = arith.maximumf %8, %9 : vector<16x1xf32>
    %11 = math.rsqrt %10 : vector<16x1xf32>
    %12 = vector.broadcast %11 : vector<16x1xf32> to vector<16x128xf32>
    %13 = arith.mulf %5, %12 : vector<16x128xf32>
    %c0_6 = arith.constant 0 : index
    %14 = memref.load %arg1[%c0_6] : memref<1xf32, #tpu.memory_space<smem>>
    %15 = math.exp %14 : f32
    %16 = arith.truncf %13 : vector<16x128xf32> to vector<16x128xbf16>
    %c0_7 = arith.constant 0 : index
    %c0_8 = arith.constant 0 : index
    %17 = vector.load %arg9[%c0_7, %c0_8] : memref<128x128xbf16, #tpu.memory_space<vmem>>, vector<128x128xbf16>
    %cst_9 = arith.constant dense<0.000000e+00> : vector<16x128xf32>
    %18 = tpu.matmul %16, %17, %cst_9 {dimension_numbers = #tpu.dot_dimension_numbers<[1], [0], [0], [1], [0, 0, 1, 1], [], []>} : vector<16x128xbf16>, vector<128x128xbf16>, vector<16x128xf32> -> vector<16x128xf32>
    %19 = vector.broadcast %15 : f32 to vector<16x128xf32>
    %20 = arith.mulf %18, %19 : vector<16x128xf32>
    %c0_10 = arith.constant 0 : index
    %c0_11 = arith.constant 0 : index
    %21 = vector.load %arg8[%c0_10, %c0_11] : memref<16x128xf32, #tpu.memory_space<vmem>>, vector<16x128xf32>
    tpu.vector_store %arg8[%c0_10, %c0_11], %20 {strides = array<i32>} : memref<16x128xf32, #tpu.memory_space<vmem>>, vector<16x128xf32>,
    %22 = tpu.iota {dimensions = array<i32: 1>} : vector<16x128xi32>
    %c4_i32 = arith.constant 4 : i32
    %23 = vector.broadcast %c4_i32 : i32 to vector<16x128xi32>
    %24 = arith.cmpi slt, %22, %23 : vector<16x128xi32>
    %cst_12 = arith.constant 0xFF800000 : f32
    %25 = vector.broadcast %cst_12 : f32 to vector<16x128xf32>
    %26 = arith.select %24, %20, %25 : vector<16x128xi1>, vector<16x128xf32>
    %cst_13 = arith.constant dense<0xFF800000> : vector<16xf32>
    %27 = vector.multi_reduction <maximumf>, %26, %cst_13 [1] : vector<16x128xf32> to vector<16xf32>
    %28 = vector.shape_cast %27 : vector<16xf32> to vector<16x1xf32>
    %29 = vector.broadcast %28 : vector<16x1xf32> to vector<16x128xf32>
    %30 = arith.subf %26, %29 : vector<16x128xf32>
    %31 = math.exp %30 : vector<16x128xf32>
    %cst_14 = arith.constant dense<0.000000e+00> : vector<16xf32>
    %32 = vector.multi_reduction <add>, %31, %cst_14 [1] : vector<16x128xf32> to vector<16xf32>
    %33 = vector.shape_cast %32 : vector<16xf32> to vector<16x1xf32>
    %34 = math.log %33 : vector<16x1xf32>
    %35 = arith.addf %28, %34 : vector<16x1xf32>
    %c0_15 = arith.constant 0 : index
    %c0_16 = arith.constant 0 : index
    %36 = vector.load %arg2[%c0_15, %c0_16] : memref<16x1xi32, #tpu.memory_space<vmem>>, vector<16x1xi32>
    %37 = vector.broadcast %36 : vector<16x1xi32> to vector<16x128xi32>
    %38 = arith.cmpi eq, %22, %37 : vector<16x128xi32>
    %39 = arith.extui %38 : vector<16x128xi1> to vector<16x128xi32>
    %40 = arith.sitofp %39 : vector<16x128xi32> to vector<16x128xf32>
    %41 = arith.mulf %20, %40 : vector<16x128xf32>
    %cst_17 = arith.constant dense<0.000000e+00> : vector<16xf32>
    %42 = vector.multi_reduction <add>, %41, %cst_17 [1] : vector<16x128xf32> to vector<16xf32>
    %43 = vector.shape_cast %42 : vector<16xf32> to vector<16x1xf32>
    %44 = arith.subf %35, %43 : vector<16x1xf32>
    %c16_i32 = arith.constant 16 : i32
    %45 = arith.muli %arg0, %c16_i32 : i32
    %46 = tpu.iota {dimensions = array<i32: 0>} : vector<16x1xi32>
    %47 = vector.broadcast %45 : i32 to vector<16x1xi32>
    %48 = arith.addi %47, %46 : vector<16x1xi32>
    %c2_i32 = arith.constant 2 : i32
    %49 = vector.broadcast %c2_i32 : i32 to vector<16x1xi32>
    %50 = arith.cmpi slt, %48, %49 : vector<16x1xi32>
    %cst_18 = arith.constant 0.000000e+00 : f32
    %51 = vector.broadcast %cst_18 : f32 to vector<16x1xf32>
    %52 = arith.select %50, %44, %51 : vector<16x1xi1>, vector<16x1xf32>
    %cst_19 = arith.constant dense<0.000000e+00> : vector<1xf32>
    %53 = vector.multi_reduction <add>, %52, %cst_19 [0] : vector<16x1xf32> to vector<1xf32>
    %54 = vector.shape_cast %53 : vector<1xf32> to vector<1x1xf32>
    %c0_20 = arith.constant 0 : index
    %c0_21 = arith.constant 0 : index
    %55 = vector.load %arg10[%c0_20, %c0_21] : memref<1x1xf32, #tpu.memory_space<vmem>>, vector<1x1xf32>
    %56 = arith.addf %55, %54 : vector<1x1xf32>
    %c0_22 = arith.constant 0 : index
    %c0_23 = arith.constant 0 : index
    %57 = vector.load %arg10[%c0_22, %c0_23] : memref<1x1xf32, #tpu.memory_space<vmem>>, vector<1x1xf32>
    tpu.vector_store %arg10[%c0_22, %c0_23], %56 {strides = array<i32>} : memref<1x1xf32, #tpu.memory_space<vmem>>, vector<1x1xf32>,
    %c0_i32_24 = arith.constant 0 : i32
    %58 = arith.cmpi eq, %arg0, %c0_i32_24 : i32
    %59 = arith.extui %58 : i1 to i32
    %c0_i32_25 = arith.constant 0 : i32
    %60 = arith.cmpi ne, %59, %c0_i32_25 : i32
    scf.if %60 {
      %c0_26 = arith.constant 0 : index
      %c0_27 = arith.constant 0 : index
      %61 = vector.load %arg10[%c0_26, %c0_27] : memref<1x1xf32, #tpu.memory_space<vmem>>, vector<1x1xf32>
      %cst_28 = arith.constant 5.000000e-01 : f32
      %62 = vector.broadcast %cst_28 : f32 to vector<1x1xf32>
      %63 = arith.mulf %61, %62 : vector<1x1xf32>
      %c0_29 = arith.constant 0 : index
      %c0_30 = arith.constant 0 : index
      %64 = vector.load %arg7[%c0_29, %c0_30] : memref<1x1xf32, #tpu.memory_space<vmem>>, vector<1x1xf32>
      tpu.vector_store %arg7[%c0_29, %c0_30], %63 {strides = array<i32>} : memref<1x1xf32, #tpu.memory_space<vmem>>, vector<1x1xf32>,
    } else {
    }
    return
  }
  func.func @transform_0(%arg0: i32) -> i32 {
    %c0_i32 = arith.constant 0 : i32
    %c0_i32_0 = arith.constant 0 : i32
    return %c0_i32 : i32
  }
  func.func @transform_1(%arg0: i32) -> (i32, i32) {
    %c0_i32 = arith.constant 0 : i32
    %c0_i32_0 = arith.constant 0 : i32
    return %arg0, %c0_i32 : i32, i32
  }
  func.func @transform_2(%arg0: i32) -> (i32, i32) {
    %c0_i32 = arith.constant 0 : i32
    %c0_i32_0 = arith.constant 0 : i32
    return %arg0, %c0_i32 : i32, i32
  }
  func.func @transform_3(%arg0: i32) -> (i32, i32) {
    %c0_i32 = arith.constant 0 : i32
    %c0_i32_0 = arith.constant 0 : i32
    %c0_i32_1 = arith.constant 0 : i32
    return %c0_i32, %c0_i32_0 : i32, i32
  }
  func.func @transform_4(%arg0: i32) -> (i32, i32) {
    %c0_i32 = arith.constant 0 : i32
    %c0_i32_0 = arith.constant 0 : i32
    %c0_i32_1 = arith.constant 0 : i32
    return %c0_i32, %c0_i32_0 : i32, i32
  }
  func.func @transform_5(%arg0: i32) -> (i32, i32) {
    %c0_i32 = arith.constant 0 : i32
    %c0_i32_0 = arith.constant 0 : i32
    %c0_i32_1 = arith.constant 0 : i32
    return %c0_i32, %c0_i32_0 : i32, i32
  }
  func.func @transform_6(%arg0: i32) -> (i32, i32) {
    %c0_i32 = arith.constant 0 : i32
    %c0_i32_0 = arith.constant 0 : i32
    %c0_i32_1 = arith.constant 0 : i32
    return %c0_i32, %c0_i32_0 : i32, i32
  }
  func.func @transform_7(%arg0: i32) -> (i32, i32) {
    %c0_i32 = arith.constant 0 : i32
    %c0_i32_0 = arith.constant 0 : i32
    return %arg0, %c0_i32 : i32, i32
  }
}

</mosaic_0001>

<bundles_post_ra>
// kernel: tpu_custom_call.1
= control target key start
LH: loop header
LB: loop body
LE: loop exit
PB: predicated region body
PF: predicated region fallthrough
CT: control target
= control target key end

     0   :  { %14 = vsyncpa [#allocation6], 0  ;;  %s1198_s0 = inlined_call_operand.<no memory space> [shape: f32[1], index: 0, kind: input, shape index: {}]   ;;  %s1199_s1 = inlined_call_operand.vmem [shape: s32[16,1], index: 1, kind: input, shape index: {}]   ;;  %s1200_s2 = inlined_call_operand.vmem [shape: bf16[16,128], index: 2, kind: input, shape index: {}]   ;;  %s1201_s3 = inlined_call_operand.hbm [shape: bf16[128,128], index: 3, kind: input, shape index: {}]   ;;  %s1202_s4 = inlined_call_operand.hbm [shape: bf16[128,128], index: 4, kind: input, shape index: {}]   ;;  %s1203_s5 = inlined_call_operand.hbm [shape: bf16[128,128], index: 5, kind: input, shape index: {}]   ;;  %s1204_s6 = inlined_call_operand.hbm [shape: f32[1,1], index: 6, kind: output, shape index: {0}]   ;;  %s1205_s7 = inlined_call_operand.hbm [shape: f32[16,128], index: 7, kind: output, shape index: {1}]  }
   0x1   :  { %15 = vsyncpa [#allocation9], 0 }
   0x2   :  { %16 = vsyncpa [#allocation7], 0 }
   0x3   :  { %17 = vsyncpa [#allocation13], 0  ;;  %s41_s26 = sshll.u32 %s1202_s4, 4  ;;  %s1055_s27 = smov [#allocation8]   ;;  %s42_s26 = int_to_ptr.hbm [resolvable:$true] %s41_s26 }
   0x4   :  { %s43_s28 = sshll.u32 %s1055_s27, 4  ;;  %s28_s8 = sshll.u32 %s1201_s3, 4  ;;  %s44_s28 = int_to_ptr.vmem [resolvable:$true] %s43_s28  ;;  %s29_s8 = int_to_ptr.hbm [resolvable:$true] %s28_s8 }
   0x5   :  { %s1056_s9 = smov 64   ;;  %s1057_s10 = smov 4  }
   0x6   :  { %49 = dma.hbm_to_vmem [thread:$0]  %s42_s26, 1024, %s44_s28, [#allocation9], %s1056_s9, %s1056_s9, %s1057_s10  }
   0x7   :  { %s1058_s11 = smov [#allocation5]   ;;  %s54_s15 = sshll.u32 %s1203_s5, 4  ;;  %s55_s15 = int_to_ptr.hbm [resolvable:$true] %s54_s15 }
   0x8   :  { %s30_s12 = sshll.u32 %s1058_s11, 4  ;;  %s1059_s4 = smov [#allocation10]   ;;  %s31_s12 = int_to_ptr.vmem [resolvable:$true] %s30_s12 }
   0x9   :  { %36 = dma.hbm_to_vmem [thread:$0]  %s29_s8, 1024, %s31_s12, [#allocation6], %s1056_s9, %s1056_s9, %s1057_s10  }
   0xa   :  { %s56_s16 = sshll.u32 %s1059_s4, 4  ;;  %s57_s16 = int_to_ptr.vmem [resolvable:$true] %s56_s16 }
   0xb   :  { %62 = dma.hbm_to_vmem [thread:$0]  %s55_s15, 1024, %s57_s16, [#allocation9], %s1056_s9, %s1056_s9, %s1057_s10  }
   0xc   :  { %1047 = dma.done.wait [#allocation6], 1024  }
   0xd   :  { %1048 = vsyncadd [#allocation6], 4294966272 }
   0xe   :  { %1049 = dma.done.wait [#allocation9], 2048  }
   0xf   :  { %1050 = vsyncadd [#allocation9], 4294965248  ;;  %v819_v0 = vld [vmem:[#allocation10 + $0x38] sm:$0xff]  ;;  %v818_v1 = vld [vmem:[#allocation10 + $0x30] sm:$0xff]  ;;  %vm352_vm10 = vcmask 0   ;;  %s1062_s20 = smov [#allocation12]  }
  0x10   :  { %207 = vmatpush.bf16.msra.mxu0 %v819_v0  ;;  %884 = vmatpush.bf16.msra.mxu1 %v819_v0  ;;  %v817_v2 = vld [vmem:[#allocation10 + $0x28] sm:$0xff]  ;;  %v816_v3 = vld [vmem:[#allocation10 + $0x20] sm:$0xff]  ;;  %v815_v4 = vld [vmem:[#allocation10 + $0x18] sm:$0xff]  ;;  %s649_s21 = sshll.u32 %s1062_s20, 4  ;;  %s651_s23 = sshll.u32 %s1205_s7, 4  ;;  %s650_s21 = int_to_ptr.vmem [resolvable:$true] %s649_s21  ;;  %s652_s23 = int_to_ptr.hbm [resolvable:$true] %s651_s23 }
  0x11   :  { %885 = vmatpush.bf16.msra.mxu3 %v819_v0  ;;  %v814_v5 = vld [vmem:[#allocation10 + $0x10] sm:$0xff]  ;;  %v813_v6 = vld [vmem:[#allocation10 + $0x8] sm:$0xff]  ;;  %v812_v7 = vld [vmem:[#allocation10] sm:$0xff]  ;;  %s1063_s24 = smov 128   ;;  %s1064_s25 = smov 8  }
  0x12   :  { %v828_v8 = vld [vmem:[#allocation5 + $0x38] sm:$0xff]  ;;  %v804_v9 = vld [vmem:[#allocation8] sm:$0xff]  ;;  %v809_v11 = vld [vmem:[#allocation8 + $0x28] sm:$0xff]  ;;  %s1065_s7 = smov [#allocation11]   ;;  %s641_s29 = sshll.u32 %s1204_s6, 4  ;;  %s642_s29 = int_to_ptr.hbm [resolvable:$true] %s641_s29 }
  0x13   :  { %v807_v10 = vld [vmem:[#allocation8 + $0x18] sm:$0xff]  ;;  %v827_v12 = vld [vmem:[#allocation5 + $0x30] sm:$0xff]  ;;  %v826_v13 = vld [vmem:[#allocation5 + $0x28] sm:$0xff]  ;;  %s639_s26 = sshll.u32 %s1065_s7, 4  ;;  %s640_s26 = int_to_ptr.vmem [resolvable:$true] %s639_s26 }
  0x14   :  { %208 = vmatpush.bf16.msra.mxu0 %v818_v1  ;;  %886 = vmatpush.bf16.msra.mxu1 %v818_v1  ;;  %v825_v14 = vld [vmem:[#allocation5 + $0x20] sm:$0xff]  ;;  %v824_v15 = vld [vmem:[#allocation5 + $0x18] sm:$0xff]  ;;  %v805_v16 = vld [vmem:[#allocation8 + $0x8] sm:$0xff] }
  0x15   :  { %887 = vmatpush.bf16.msra.mxu3 %v818_v1  ;;  %v808_v17 = vld [vmem:[#allocation8 + $0x20] sm:$0xff]  ;;  %v810_v18 = vld [vmem:[#allocation8 + $0x30] sm:$0xff]  ;;  %v822_v20 = vld [vmem:[#allocation5 + $0x8] sm:$0xff] }
  0x16   :  { %v823_v19 = vld [vmem:[#allocation5 + $0x10] sm:$0xff]  ;;  %v821_v21 = vld [vmem:[#allocation5] sm:$0xff]  ;;  %v811_v24 = vld [vmem:[#allocation8 + $0x38] sm:$0xff] }
  0x17   :  { %v806_v22 = vld [vmem:[#allocation8 + $0x10] sm:$0xff]  ;;  %v820_v23 = vld [vmem:[%s1200_s2] sm:$0xff] }
  0x18   :  { %209 = vmatpush.bf16.msra.mxu0 %v817_v2  ;;  %888 = vmatpush.bf16.msra.mxu1 %v817_v2 }
  0x19   :  { %889 = vmatpush.bf16.msra.mxu3 %v817_v2 }
  0x1c   :  { %210 = vmatpush.bf16.msra.mxu0 %v816_v3  ;;  %890 = vmatpush.bf16.msra.mxu1 %v816_v3 }
  0x1d   :  { %891 = vmatpush.bf16.msra.mxu3 %v816_v3 }
  0x20   :  { %211 = vmatpush.bf16.msra.mxu0 %v815_v4  ;;  %892 = vmatpush.bf16.msra.mxu1 %v815_v4 }
  0x21   :  { %893 = vmatpush.bf16.msra.mxu3 %v815_v4 }
  0x24   :  { %212 = vmatpush.bf16.msra.mxu0 %v814_v5  ;;  %894 = vmatpush.bf16.msra.mxu1 %v814_v5 }
  0x25   :  { %895 = vmatpush.bf16.msra.mxu3 %v814_v5 }
  0x28   :  { %213 = vmatpush.bf16.msra.mxu0 %v813_v6  ;;  %896 = vmatpush.bf16.msra.mxu1 %v813_v6 }
  0x29   :  { %897 = vmatpush.bf16.msra.mxu3 %v813_v6 }
  0x2c   :  { %214 = vmatpush.bf16.msra.mxu0 %v812_v7  ;;  %898 = vmatpush.bf16.msra.mxu1 %v812_v7 }
  0x2d   :  { %899 = vmatpush.bf16.msra.mxu3 %v812_v7 }
  0x2f   :  { %215 = vmatmul.bf16.vlgmr.msra.gmra.mxu0 %v804_v9  ;;  %230 = vmatmul.bf16.vlgmr.msra.gmra.mxu1 %v807_v10 }
  0x30   :  { %426 = vmatpush.bf16.msrb.mxu1 %v828_v8  ;;  %240 = vmatmul.bf16.vlgmr.msra.gmra.mxu3 %v809_v11 }
  0x34   :  { %427 = vmatpush.bf16.msrb.mxu1 %v827_v12 }
  0x38   :  { %428 = vmatpush.bf16.msrb.mxu1 %v826_v13 }
  0x3c   :  { %429 = vmatpush.bf16.msrb.mxu1 %v825_v14 }
  0x3f   :  { %220 = vmatmul.bf16.gmra.mxu0 %v805_v16  ;;  %235 = vmatmul.bf16.gmra.mxu1 %v808_v17 }
  0x40   :  { %430 = vmatpush.bf16.msrb.mxu1 %v824_v15  ;;  %245 = vmatmul.bf16.gmra.mxu3 %v810_v18 }
  0x44   :  { %431 = vmatpush.bf16.msrb.mxu1 %v823_v19 }
  0x48   :  { %432 = vmatpush.bf16.msrb.mxu1 %v822_v20 }
  0x4c   :  { %433 = vmatpush.bf16.msrb.mxu1 %v821_v21 }
  0x4f   :  { %225 = vmatmul.bf16.gmra.mxu0 %v806_v22  ;;  %434 = vmatmul.bf16.vlgmr.msrb.gmra.mxu1 %v820_v23 }
  0x50   :  { %250 = vmatmul.bf16.gmra.mxu3 %v811_v24 }
  0xac   :  { %v1118_v25 = vpop.f32.mrf.mxu0  ;;  %v1120_v26 = vpop.f32.mrf.mxu1 }
  0xad   :  { %v256_v33 = vmul.f32 %v1118_v25, %v1118_v25  ;;  %v262_v53 = vmul.f32 %v1120_v26, %v1120_v26 }
  0xb3   :  { %v1122_v27 = vpop.f32.mrf.mxu3 }
  0xb4   :  { %v1124_v28 = vpop.f32.mrf.mxu0  ;;  %v1126_v29 = vpop.f32.mrf.mxu1  ;;  %v266_v60 = vmul.f32 %v1122_v27, %v1122_v27 }
  0xb5   :  { %v257_v34 = vmul.f32 %v1124_v28, %v1124_v28  ;;  %v263_v55 = vmul.f32 %v1126_v29, %v1126_v29 }
  0xb7   :  { %v272_v38 = vadd.f32 %v257_v34, %v256_v33 }
  0xbb   :  { %v1128_v30 = vpop.f32.mrf.mxu3 }
  0xbc   :  { %v1130_v31 = vpop.f32.mrf.mxu0  ;;  %v1132_v32 = vpop.f32.mrf.mxu1  ;;  %v267_v63 = vmul.f32 %v1128_v30, %v1128_v30 }
  0xbd   :  { %v258_v39 = vmul.f32 %v1130_v31, %v1130_v31  ;;  %v264_v58 = vmul.f32 %v1132_v32, %v1132_v32 }
  0xbf   :  { %v273_v40 = vadd.f32 %v272_v38, %v258_v39 }
  0xc3   :  { %v246_v37 = vpop.f32.mrf.mxu3 }
  0xc4   :  { %v1138_v35 = vpop.f32.mrf.mxu0  ;;  %v1140_v36 = vpop.f32.mrf.mxu1  ;;  %v268_v1 = vmul.f32 %v246_v37, %v246_v37 }
  0xc5   :  { %v259_v41 = vmul.f32 %v1138_v35, %v1138_v35  ;;  %v265_v61 = vmul.f32 %v1140_v36, %v1140_v36 }
  0xc7   :  { %v274_v45 = vadd.f32 %v273_v40, %v259_v41 }
  0xcb   :  { %v248_v47 = vpop.f32.mrf.mxu3 }
  0xcc   :  { %v1146_v42 = vpop.f32.mrf.mxu0  ;;  %v1148_v43 = vpop.f32.mrf.mxu1  ;;  %v269_v3 = vmul.f32 %v248_v47, %v248_v47 }
  0xcd   :  { %v440_v44 = vmul.f32 %v1148_v43, %v1148_v43  ;;  %v260_v46 = vmul.f32 %v1146_v42, %v1146_v42 }
  0xcf   :  { %442 = vadd.xlane.f32.xlu0 %v440_v44  ;;  %v275_v48 = vadd.f32 %v274_v45, %v260_v46 }
  0xd3   :  { %v251_v57 = vpop.f32.mrf.mxu3 }
  0xd4   :  { %v228_v49 = vpop.f32.mrf.mxu0  ;;  %v1154_v50 = vpop.f32.mrf.mxu1  ;;  %v270_v7 = vmul.f32 %v251_v57, %v251_v57 }
  0xd5   :  { %v261_v51 = vmul.f32 %v228_v49, %v228_v49  ;;  %v441_v52 = vmul.f32 %v1154_v50, %v1154_v50 }
  0xd7   :  { %v276_v54 = vadd.f32 %v275_v48, %v261_v51  ;;  %444 = vadd.xlane.f32.xlu0 %v441_v52 }
  0xd9   :  { %v277_v56 = vadd.f32 %v276_v54, %v262_v53 }
  0xdb   :  { %v278_v59 = vadd.f32 %v277_v56, %v263_v55  ;;  %v253_v5 = vpop.f32.mrf.mxu3 }
  0xdc   :  { %v271_v9 = vmul.f32 %v253_v5, %v253_v5 }
  0xdd   :  { %v279_v62 = vadd.f32 %v278_v59, %v264_v58 }
  0xdf   :  { %v280_v0 = vadd.f32 %v279_v62, %v265_v61  ;;  %v471_v62 = vstv %s1198_s0 }
  0xe1   :  { %v281_v2 = vadd.f32 %v280_v0, %v266_v60 }
  0xe3   :  { %v282_v4 = vadd.f32 %v281_v2, %v267_v63  ;;  %v472_v63 = vmul.f32 1.442695, %v471_v62 }
  0xe5   :  { %v283_v6 = vadd.f32 %v282_v4, %v268_v1 }
  0xe7   :  { %v284_v8 = vadd.f32 %v283_v6, %v269_v3 }
  0xe9   :  { %v285_v10 = vadd.f32 %v284_v8, %v270_v7 }
  0xeb   :  { %v286_v11 = vadd.f32 %v285_v10, %v271_v9 }
  0xed   :  { %v287_v12 = vrot.slane %v286_v11, 4 }
  0xef   :  { %v288_v13 = vadd.f32 %v287_v12, %v286_v11 }
  0xf1   :  { %v289_v14 = vrot.slane %v288_v13, 2 }
  0xf3   :  { %v290_v15 = vadd.f32 %v289_v14, %v288_v13 }
  0xf5   :  { %v291_v16 = vrot.slane %v290_v15, 1 }
  0xf7   :  { %v292_v17 = vadd.f32 %v291_v16, %v290_v15 }
  0xf9   :  { %v293_v18 = vmax.f32 %v292_v17, 1e-12 }
  0xfb   :  { %915 = vrsqrt.f32 %v293_v18  ;;  %vm300_vm1 = vweird.f32 %v293_v18 }
 0x101   :  { %v916_v19 = vpop.eup %915 }
 0x102   :  { %v295_v20 = vmul.f32 %v916_v19, %v293_v18  ;;  %vm301_vm0 = vweird.f32 %v916_v19 }
 0x103   :  { %vm302_vm2 = vmor %vm300_vm1, %vm301_vm0 }
 0x104   :  { %v296_v21 = vmul.f32 %v916_v19, %v295_v20  ;;  %v1060_v20 = vmov 0  }
 0x105   :  { %913 = vset.pattern.permute.xlu1 %v1060_v20  ;;  %914 = vset.pattern.permute.xlu0 %v1060_v20 }
 0x106   :  { %v297_v22 = vmul.f32 0.5, %v296_v21  ;;  %v559_v21 = vlaneseq }
 0x108   :  { %v298_v23 = vsub.f32 1.5, %v297_v22  ;;  %v560_v22 = vand.u32 127, %v559_v21 }
 0x10a   :  { %v299_v24 = vmul.f32 %v916_v19, %v298_v23  ;;  %vm561_vm9 = vcmp.lt.s32.totalorder %v560_v22, 4 }
 0x10c   :  { %v303_v33 = vsel %vm302_vm2, %v916_v19, %v299_v24 }
 0x10d   :  { %v318_v34 = vmul.f32 %v303_v33, %v251_v57  ;;  %v319_v38 = vmul.f32 %v303_v33, %v253_v5  ;;  %v316_v39 = vmul.f32 %v303_v33, %v246_v37  ;;  %v317_v40 = vmul.f32 %v303_v33, %v248_v47 }
 0x10e   :  { %v314_v41 = vmul.f32 %v303_v33, %v1122_v27  ;;  %v315_v44 = vmul.f32 %v303_v33, %v1128_v30  ;;  %v312_v45 = vmul.f32 %v303_v33, %v1132_v32  ;;  %v313_v46 = vmul.f32 %v303_v33, %v1140_v36 }
 0x10f   :  { %v875_v48 = vpack.c.bf16 %v319_v38, %v318_v34  ;;  %v870_v51 = vpack.c.bf16 %v317_v40, %v316_v39  ;;  %v310_v52 = vmul.f32 %v303_v33, %v1120_v26  ;;  %v311_v53 = vmul.f32 %v303_v33, %v1126_v29 }
 0x110   :  { %v865_v54 = vpack.c.bf16 %v315_v44, %v314_v41  ;;  %v860_v55 = vpack.c.bf16 %v313_v46, %v312_v45  ;;  %v308_v56 = vmul.f32 %v303_v33, %v1146_v42  ;;  %v309_v37 = vmul.f32 %v303_v33, %v228_v49 }
 0x111   :  { %883 = vst [vmem:[#allocation2 + $0x38] sm:$0xff] %v875_v48   ;;  %v855_v47 = vpack.c.bf16 %v311_v53, %v310_v52  ;;  %v306_v27 = vmul.f32 %v303_v33, %v1130_v31  ;;  %v307_v30 = vmul.f32 %v303_v33, %v1138_v35  ;;  %v304_v32 = vmul.f32 %v303_v33, %v1118_v25 }
 0x112   :  { %882 = vst [vmem:[#allocation2 + $0x28] sm:$0xff] %v870_v51   ;;  %v850_v36 = vpack.c.bf16 %v309_v37, %v308_v56  ;;  %v305_v57 = vmul.f32 %v303_v33, %v1124_v28 }
 0x113   :  { %881 = vst [vmem:[#allocation2 + $0x20] sm:$0xff] %v865_v54   ;;  %v845_v26 = vpack.c.bf16 %v307_v30, %v306_v27 }
 0x114   :  { %880 = vst [vmem:[#allocation2 + $0x8] sm:$0xff] %v860_v55   ;;  %v840_v29 = vpack.c.bf16 %v305_v57, %v304_v32  ;;  %v608_v55 = vshrl.u32 %v559_v21, 7 }
 0x115   :  { %879 = vst [vmem:[#allocation2 + $0x10] sm:$0xff] %v855_v47  }
 0x116   :  { %878 = vst [vmem:[#allocation2 + $0x18] sm:$0xff] %v850_v36   ;;  %vm613_vm12 = vcmp.lt.s32.totalorder %v608_v55, 2 }
 0x117   :  { %877 = vst [vmem:[#allocation2] sm:$0xff] %v845_v26  }
 0x118   :  { %v836_v42 = vld [vmem:[#allocation2 + $0x38] sm:$0xff]  ;;  %841 = vst [vmem:[#allocation2 + $0x30] sm:$0xff] %v840_v29  }
 0x119   :  { %540 = vmatpush.bf16.msra.mxu2 %v836_v42  ;;  %v835_v49 = vld [vmem:[#allocation2 + $0x28] sm:$0xff] }
 0x11a   :  { %v834_v31 = vld [vmem:[#allocation2 + $0x20] sm:$0xff] }
 0x11b   :  { %v833_v35 = vld [vmem:[#allocation2 + $0x8] sm:$0xff] }
 0x11c   :  { %v832_v25 = vld [vmem:[#allocation2 + $0x10] sm:$0xff] }
 0x11d   :  { %541 = vmatpush.bf16.msra.mxu2 %v835_v49  ;;  %v831_v58 = vld [vmem:[#allocation2 + $0x18] sm:$0xff] }
 0x11e   :  { %v830_v28 = vld [vmem:[#allocation2] sm:$0xff] }
 0x11f   :  { %v829_v59 = vld [vmem:[#allocation2 + $0x30] sm:$0xff] }
 0x121   :  { %542 = vmatpush.bf16.msra.mxu2 %v834_v31 }
 0x125   :  { %543 = vmatpush.bf16.msra.mxu2 %v833_v35 }
 0x129   :  { %544 = vmatpush.bf16.msra.mxu2 %v832_v25 }
 0x12d   :  { %545 = vmatpush.bf16.msra.mxu2 %v831_v58 }
 0x131   :  { %546 = vmatpush.bf16.msra.mxu2 %v830_v28 }
 0x135   :  { %547 = vmatpush.bf16.msra.mxu2 %v829_v59 }
 0x142   :  { %v443_v60 = vpop.xlane.xlu0 %442 }
 0x143   :  { %v446_v61 = vmax.f32 %v443_v60, 1e-12 }
 0x145   :  { %917 = vrsqrt.f32 %v446_v61  ;;  %vm454_vm4 = vweird.f32 %v446_v61 }
 0x146   :  { %919 = vpow2.f32 %v472_v63 }
 0x14a   :  { %v445_v0 = vpop.xlane.xlu0 %444 }
 0x14b   :  { %v918_v1 = vpop.eup %917  ;;  %v447_v2 = vmax.f32 %v445_v0, 1e-12 }
 0x14c   :  { %v920_v3 = vpop.eup %919  ;;  %v449_v4 = vmul.f32 %v918_v1, %v446_v61  ;;  %vm455_vm3 = vweird.f32 %v918_v1 }
 0x14d   :  { %921 = vrsqrt.f32 %v447_v2  ;;  %900 = vpush %v920_v3  ;;  %vm456_vm6 = vmor %vm454_vm4, %vm455_vm3  ;;  %vm464_vm7 = vweird.f32 %v447_v2 }
 0x14e   :  { %v450_v5 = vmul.f32 %v918_v1, %v449_v4 }
 0x150   :  { %v451_v6 = vmul.f32 0.5, %v450_v5 }
 0x152   :  { %v452_v8 = vsub.f32 1.5, %v451_v6 }
 0x153   :  { %v922_v7 = vpop.eup %921 }
 0x154   :  { %v459_v9 = vmul.f32 %v922_v7, %v447_v2  ;;  %v453_v12 = vmul.f32 %v918_v1, %v452_v8  ;;  %vm465_vm5 = vweird.f32 %v922_v7 }
 0x155   :  { %vm466_vm8 = vmor %vm464_vm7, %vm465_vm5 }
 0x156   :  { %v460_v10 = vmul.f32 %v922_v7, %v459_v9  ;;  %v457_v14 = vsel %vm456_vm6, %v918_v1, %v453_v12 }
 0x157   :  { %v468_v17 = vmul.f32 %v457_v14, %v1148_v43  ;;  %v584_v43 = vld [vmem:[%s1199_s1] sm:$0xff] }
 0x158   :  { %v461_v11 = vmul.f32 0.5, %v460_v10 }
 0x15a   :  { %v462_v13 = vsub.f32 1.5, %v461_v11 }
 0x15c   :  { %v463_v15 = vmul.f32 %v922_v7, %v462_v13 }
 0x15e   :  { %v467_v16 = vsel %vm466_vm8, %v922_v7, %v463_v15 }
 0x15f   :  { %v469_v18 = vmul.f32 %v467_v16, %v1154_v50  ;;  %v1061_v50 = vmov 0.0  }
 0x160   :  { %353 = vst.msk [vmem:[#allocation3] sm:$0x1] %vm352_vm10, %v1061_v50 }
 0x161   :  { %v475_v19 = vpack.c.bf16 %v469_v18, %v468_v17 }
 0x163   :  { %548 = vmatmul.bf16.vlgmr.msra.gmra.mxu2 %v475_v19 }
 0x167   :  { %v624_v29 = vld [vmem:[#allocation3] sm:$0x1] }
 0x17e   :  { %s901_s0 = spop %900 }
 0x17f   :  { %v554_v23 = vstv %s901_s0 }
 0x1e6   :  { %v549_v24 = vpop.f32.mrf.mxu2 }
 0x1e7   :  { %v555_v33 = vmul.f32 %v554_v23, %v549_v24 }
 0x1e9   :  { %557 = vst [vmem:[#allocation12] sm:$0xff] %v555_v33  ;;  %v562_v34 = vsel %vm561_vm9, %v555_v33, -inf }
 0x1ea   :  { %564 = vmax.xlane.f32.xlu1 %v562_v34 }
 0x1ee   :  { %v551_v38 = vpop.f32.mrf.mxu2 }
 0x1ef   :  { %v556_v39 = vmul.f32 %v554_v23, %v551_v38 }
 0x1f1   :  { %558 = vst [vmem:[#allocation12 + $0x8] sm:$0xff] %v556_v39 }
 0x1f2   :  { %657 = dma.vmem_to_hbm [thread:$0]  %s650_s21, 256, %s652_s23, [#allocation13], %s1063_s24, %s1063_s24, %s1064_s25  }
 0x203   :  { %587 = vperm.xlu1 %913, %v584_v43  }
 0x25d   :  { %v565_v40 = vpop.xlane.xlu1 %564 }
 0x25e   :  { %v568_v41 = vsub.f32 %v562_v34, %v565_v40 }
 0x260   :  { %v570_v44 = vmul.f32 1.442695, %v568_v41 }
 0x262   :  { %923 = vpow2.f32 %v570_v44 }
 0x268   :  { %v924_v45 = vpop.eup %923 }
 0x269   :  { %574 = vadd.xlane.f32.xlu2 %v924_v45 }
 0x275   :  { %v588_v46 = vpop.permute.xlu1 %587 }
 0x276   :  { %vm592_vm11 = vcmp.eq.s32.totalorder %v560_v22, %v588_v46 }
 0x277   :  { %v802_v48 = vsel %vm592_vm11, 1.0, %v1061_v50 }
 0x278   :  { %v598_v51 = vmul.f32 %v802_v48, %v555_v33 }
 0x27a   :  { %600 = vadd.xlane.f32.xlu2 %v598_v51 }
 0x2dc   :  { %v575_v52 = vpop.xlane.xlu2 %574 }
 0x2dd   :  { %925 = vlog2.f32 %v575_v52 }
 0x2e3   :  { %v926_v53 = vpop.eup %925 }
 0x2e4   :  { %v579_v54 = vmul.f32 0.6931472, %v926_v53 }
 0x2e6   :  { %v582_v56 = vadd.f32 %v579_v54, %v565_v40 }
 0x2ed   :  { %v601_v37 = vpop.xlane.xlu2 %600 }
 0x2ee   :  { %v604_v47 = vsub.f32 %v582_v56, %v601_v37 }
 0x2f0   :  { %v615_v27 = vsel %vm613_vm12, %v604_v47, 0.0 }
 0x2f1   :  { %v618_v30 = vrot.slane %v615_v27, 4 }
 0x2f3   :  { %v619_v32 = vadd.f32 %v618_v30, %v615_v27 }
 0x2f5   :  { %v620_v36 = vrot.slane %v619_v32, 2 }
 0x2f7   :  { %v621_v57 = vadd.f32 %v620_v36, %v619_v32 }
 0x2f9   :  { %v622_v26 = vrot.slane %v621_v57, 1 }
 0x2fb   :  { %v623_v42 = vadd.f32 %v622_v26, %v621_v57 }
 0x2fd   :  { %v625_v49 = vadd.f32 %v624_v29, %v623_v42 }
 0x2ff   :  { %627 = vst.msk [vmem:[#allocation3] sm:$0x1] %vm352_vm10, %v625_v49 }
 0x306   :  { %v631_v31 = vld [vmem:[#allocation3] sm:$0x1] }
 0x307   :  { %v632_v35 = vmul.f32 0.5, %v631_v31 }
 0x309   :  { %633 = vst.msk [vmem:[#allocation11] sm:$0x1] %vm352_vm10, %v632_v35 }
 0x30a   :  { %644 = dma.vmem_to_hbm [thread:$0]  %s640_s26, 16, %s642_s29, [#allocation7]  }
 0x30b   :  { %1051 = dma.done.wait [#allocation7], 16  }
 0x30c   :  { %1052 = vsyncadd [#allocation7], 4294967280 }
 0x30d   :  { %1053 = dma.done.wait [#allocation13], 256  }
 0x30e   :  { %1054 = vsyncadd [#allocation13], 4294967040 }
 0x30f   :  { %666 = vsyncpa [#allocation6], 1 }
 0x310   :  { %667 = vsyncpa [#allocation9], 1 }
 0x311   :  { %668 = vsyncpa [#allocation7], 1 }
 0x312   :  { %669 = vsyncpa [#allocation13], 1 }

</bundles_post_ra>
